<compile_context>
chip_gen: v7x
topology: tpu7x:2x2x1
jax: 0.10.0
libtpu: 0.0.40
codegen_flags: <defaults>
</compile_context>

<pallas_src>
import numpy as np
import jax
import jax.numpy as jnp
from jax.experimental import pallas as pl
from jax.experimental.pallas import tpu as pltpu


def _round_up(a, m):
    return ((a + m - 1) // m) * m


def _make_noisy_conv1d_kernel(K, pad, L, L_out):
    """Kernel for one batch tile, NCL layout (L on lanes).

    x_ref: (B_t, C_in, L)        input tile, matmul dtype
    w_ref: (K, C_out, C_in)      effective (noisy) per-tap weight, resident
    b_ref: (C_out, 1)            effective (noisy) bias, f32, resident
    o_ref: (B_t, C_out, L_out)   NCL output tile, f32
    """
    def kernel(x_ref, w_ref, b_ref, o_ref):
        B_t, C_in, _ = x_ref.shape
        C_out = w_ref.shape[1]

        x = x_ref[...]                                        # (B_t, C_in, L)
        acc = jnp.zeros((B_t, C_out, L_out), jnp.float32)

        for t in range(K):                                    # static unroll, K small
            d = t - pad                                       # lane shift for this tap
            lo, hi = max(0, d), min(L, L_out + d)             # valid source columns
            if hi <= lo:                                      # tap entirely in the halo
                continue
            left, right = lo - d, L_out - (hi - d)            # zero columns each side
            parts = []
            if left:
                parts.append(jnp.zeros((B_t, C_in, left), x.dtype))
            parts.append(x[:, :, lo:hi])                      # lane-dense shifted view
            if right:
                parts.append(jnp.zeros((B_t, C_in, right), x.dtype))
            x_t = parts[0] if len(parts) == 1 else jnp.concatenate(parts, axis=-1)

            # Batched MXU matmul: (B_t, C_out, C_in) @ (B_t, C_in, L_out) -> NCL tile.
            w_t = jnp.broadcast_to(w_ref[t], (B_t, C_out, C_in))
            acc = acc + jnp.einsum('boi,bil->bol', w_t, x_t,
                                   preferred_element_type=jnp.float32)

        acc = acc + b_ref[...]                                # (C_out,1) broadcast, f32
        o_ref[...] = acc.astype(o_ref.dtype)

    return kernel


def noisy_conv1d(x, weight_mu, weight_sigma, weight_eps,
                 bias_mu, bias_sigma, bias_eps,
                 noise_level=1.0, training=True,
                 matmul_dtype=jnp.bfloat16):
    """x: (N, C_in, L) -> (N, C_out, L_out) float32, PyTorch NCL layout."""
    N, C_in, L = x.shape
    C_out, _, K = weight_mu.shape
    pad = K // 2
    L_out = L + 2 * pad - K + 1

    # --- Effective (noisy) parameters: folded ONCE here, not per grid step. ---
    nl = jnp.float32(noise_level) if training else jnp.float32(0.0)
    w_eff = (weight_mu.astype(jnp.float32)
             + nl * weight_sigma.astype(jnp.float32) * weight_eps.astype(jnp.float32))
    b_eff = (bias_mu.astype(jnp.float32)
             + nl * bias_sigma.astype(jnp.float32) * bias_eps.astype(jnp.float32))

    # Per-tap weight (K, C_out, C_in) and bias (C_out, 1): tiny resident blocks.
    w_taps = jnp.transpose(w_eff, (2, 0, 1)).astype(matmul_dtype)
    b_col = b_eff.reshape(C_out, 1)

    # x stays NCL (L on lanes). Only a dtype cast (halves the dominant DMA stream
    # for bf16); in a real pipeline x would already arrive in bf16 from HBM.
    x_in = x.astype(matmul_dtype)

    # --- Batch tiling: account x/out blocks (double-buffered) AND in-kernel
    # temporaries (shifted taps, f32 accumulator), all sublane/lane padded. ---
    elt = jnp.dtype(matmul_dtype).itemsize
    sub = 16 if elt == 2 else 8
    cin_p, cout_p = _round_up(C_in, sub), _round_up(C_out, 8)
    l_p, lo_p = _round_up(L, 128), _round_up(L_out, 128)
    bytes_per_batch = (
        2 * cin_p * l_p * elt          # x block, double-buffered
        + 2 * cout_p * lo_p * 4        # f32 output block, double-buffered
        + 2 * cin_p * lo_p * elt       # shifted-tap temporaries
        + 2 * cout_p * lo_p * 4        # f32 accumulator + matmul result
    )
    budget = 10 * 1024 * 1024          # conservative: fits v7x (64 MiB VMEM/TC) and v5e
    B_tile = int(max(1, min(N, budget // max(1, bytes_per_batch), 128)))
    if N >= 2:                         # keep grid >= 2 so both v7x TCs get work
        B_tile = int(min(B_tile, pl.cdiv(N, 2)))
    grid = (pl.cdiv(N, B_tile),)       # last tile may be short; OOB rows are masked

    grid_spec = pltpu.PrefetchScalarGridSpec(
        num_scalar_prefetch=0,
        grid=grid,
        in_specs=[
            pl.BlockSpec((B_tile, C_in, L), lambda n: (n, 0, 0)),     # x tile (per step)
            pl.BlockSpec((K, C_out, C_in), lambda n: (0, 0, 0)),      # weight (resident)
            pl.BlockSpec((C_out, 1), lambda n: (0, 0)),               # bias   (resident)
        ],
        out_specs=pl.BlockSpec((B_tile, C_out, L_out), lambda n: (n, 0, 0)),
    )

    return pl.pallas_call(
        _make_noisy_conv1d_kernel(K, pad, L, L_out),
        out_shape=jax.ShapeDtypeStruct((N, C_out, L_out), jnp.float32),
        grid_spec=grid_spec,
        compiler_params=pltpu.CompilerParams(
            dimension_semantics=("parallel",),
            vmem_limit_bytes=32 * 1024 * 1024),
    )(x_in, w_taps, b_col)


def _scale_noise(key, size):
    # torch: x.sign().mul_(x.abs().sqrt_())
    v = jax.random.normal(key, (size,), jnp.float32)
    return jnp.sign(v) * jnp.sqrt(jnp.abs(v))


if __name__ == "__main__":
    # Small shapes consistent with the module: batch=2, in_channels=4,
    # out_channels=8, length=16, kernel_size=3.
    N, C_in, C_out, L, K = 2, 4, 8, 16, 3
    std_init, noise_level = 0.4, 1.0

    key = jax.random.PRNGKey(0)
    k_wmu, k_ein, k_eout, k_bmu, k_beps, k_x = jax.random.split(key, 6)

    mu_range = 1.0 / np.sqrt(C_in * K)
    weight_mu = jax.random.uniform(k_wmu, (C_out, C_in, K), jnp.float32,
                                   minval=-mu_range, maxval=mu_range)
    weight_sigma = jnp.full((C_out, C_in, K), std_init / np.sqrt(C_in * K), jnp.float32)

    # Factorized noise (reset_noise): eps_w[co, ci, :] = f(eps_out[co]) * f(eps_in[ci])
    eps_in = _scale_noise(k_ein, C_in)
    eps_out = _scale_noise(k_eout, C_out)
    weight_eps = jnp.broadcast_to(eps_out[:, None, None] * eps_in[None, :, None],
                                  (C_out, C_in, K))

    bias_mu = jax.random.uniform(k_bmu, (C_out,), jnp.float32,
                                 minval=-mu_range, maxval=mu_range)
    bias_sigma = jnp.full((C_out,), std_init / np.sqrt(C_out), jnp.float32)
    bias_eps = _scale_noise(k_beps, C_out)

    x = jax.random.normal(k_x, (N, C_in, L), jnp.float32)

    # float64 numpy reference (same semantics as F.conv1d with padding=K//2).
    def conv1d_ref(xv, wv, bv):
        x64 = np.asarray(xv, np.float64)
        w64 = np.asarray(wv, np.float64)
        b64 = np.asarray(bv, np.float64)
        pad_ = K // 2
        xp = np.pad(x64, ((0, 0), (0, 0), (pad_, pad_)))
        L_o = L + 2 * pad_ - K + 1
        y = np.zeros((N, C_out, L_o))
        for t in range(K):
            y += np.einsum('oc,ncl->nol', w64[:, :, t], xp[:, :, t:t + L_o])
        return y + b64[None, :, None]

    w_eff = weight_mu + noise_level * weight_sigma * weight_eps
    b_eff = bias_mu + noise_level * bias_sigma * bias_eps

    # 1) f32 operands: tight check.
    y32 = jax.block_until_ready(noisy_conv1d(
        x, weight_mu, weight_sigma, weight_eps, bias_mu, bias_sigma, bias_eps,
        noise_level=noise_level, training=True, matmul_dtype=jnp.float32))
    assert y32.shape == (N, C_out, L), y32.shape          # odd K => L_out == L
    np.testing.assert_allclose(np.asarray(y32), conv1d_ref(x, w_eff, b_eff),
                               rtol=1e-4, atol=1e-4)

    # 2) Default bf16 operands (f32 accumulation) — the perf default on v6e/v7x.
    ybf = jax.block_until_ready(noisy_conv1d(
        x, weight_mu, weight_sigma, weight_eps, bias_mu, bias_sigma, bias_eps,
        noise_level=noise_level, training=True))
    np.testing.assert_allclose(np.asarray(ybf), conv1d_ref(x, w_eff, b_eff),
                               rtol=5e-2, atol=5e-2)

    # 3) Eval mode: mu-only parameters (noise dropped), f32.
    yev = jax.block_until_ready(noisy_conv1d(
        x, weight_mu, weight_sigma, weight_eps, bias_mu, bias_sigma, bias_eps,
        noise_level=noise_level, training=False, matmul_dtype=jnp.float32))
    np.testing.assert_allclose(np.asarray(yev), conv1d_ref(x, weight_mu, bias_mu),
                               rtol=1e-4, atol=1e-4)

    print("KERNEL_OK")
</pallas_src>

<mosaic_0001>
module attributes {stable_mosaic.version = 11 : i64} {
  func.func @kernel(%arg0: i32, %arg1: memref<1x4x16xf32, #tpu.memory_space<vmem>>, %arg2: memref<3x8x4xf32, #tpu.memory_space<vmem>>, %arg3: memref<8x1xf32, #tpu.memory_space<vmem>>, %arg4: memref<1x8x16xf32, #tpu.memory_space<vmem>>) attributes {dimension_semantics = [#tpu.dimension_semantics<parallel>], iteration_bounds = array<i64: 2>, scalar_prefetch = 0 : i64, scratch_operands = 0 : i64, tpu.core_type = #tpu.core_type<tc>, window_params = [{transform_indices = @transform_0, window_bounds = array<i64: 1, 4, 16>}, {pipeline_mode = #tpu.pipeline_mode<synchronous>, transform_indices = @transform_1, window_bounds = array<i64: 3, 8, 4>}, {pipeline_mode = #tpu.pipeline_mode<synchronous>, transform_indices = @transform_2, window_bounds = array<i64: 8, 1>}, {transform_indices = @transform_3, window_bounds = array<i64: 1, 8, 16>}]} {
    %c0 = arith.constant 0 : index
    %c0_0 = arith.constant 0 : index
    %c0_1 = arith.constant 0 : index
    %0 = vector.load %arg1[%c0, %c0_0, %c0_1] : memref<1x4x16xf32, #tpu.memory_space<vmem>>, vector<1x4x16xf32>
    %cst = arith.constant 0.000000e+00 : f32
    %1 = vector.broadcast %cst : f32 to vector<1x8x16xf32>
    %cst_2 = arith.constant 0.000000e+00 : f32
    %2 = vector.broadcast %cst_2 : f32 to vector<1x4x1xf32>
    %3 = vector.extract_strided_slice %0 {offsets = [0, 0, 0], sizes = [1, 4, 15], strides = [1, 1, 1]} : vector<1x4x16xf32> to vector<1x4x15xf32>
    %4 = tpu.concatenate %2, %3 in 2 : vector<1x4x1xf32>, vector<1x4x15xf32> -> vector<1x4x16xf32>
    %c0_3 = arith.constant 0 : index
    %c0_4 = arith.constant 0 : index
    %c0_5 = arith.constant 0 : index
    %5 = vector.load %arg2[%c0_3, %c0_4, %c0_5] : memref<3x8x4xf32, #tpu.memory_space<vmem>>, vector<1x8x4xf32>
    %6 = vector.shape_cast %5 : vector<1x8x4xf32> to vector<8x4xf32>
    %7 = vector.shape_cast %6 : vector<8x4xf32> to vector<1x8x4xf32>
    "tpu.trace_start"() <{level = 10 : i32, message = "boi,bil->bol"}> : () -> ()
    %cst_6 = arith.constant dense<0.000000e+00> : vector<1x8x16xf32>
    %8 = tpu.matmul %7, %4, %cst_6 {dimension_numbers = #tpu.dot_dimension_numbers<[2], [1], [1], [2], [0, 0, 0, 1, 1, 2], [0], [0]>} : vector<1x8x4xf32>, vector<1x4x16xf32>, vector<1x8x16xf32> -> vector<1x8x16xf32>
    "tpu.trace_stop"() : () -> ()
    %9 = arith.addf %1, %8 : vector<1x8x16xf32>
    %c1 = arith.constant 1 : index
    %c0_7 = arith.constant 0 : index
    %c0_8 = arith.constant 0 : index
    %10 = vector.load %arg2[%c1, %c0_7, %c0_8] : memref<3x8x4xf32, #tpu.memory_space<vmem>>, vector<1x8x4xf32>
    %11 = vector.shape_cast %10 : vector<1x8x4xf32> to vector<8x4xf32>
    %12 = vector.shape_cast %11 : vector<8x4xf32> to vector<1x8x4xf32>
    "tpu.trace_start"() <{level = 10 : i32, message = "boi,bil->bol"}> : () -> ()
    %cst_9 = arith.constant dense<0.000000e+00> : vector<1x8x16xf32>
    %13 = tpu.matmul %12, %0, %cst_9 {dimension_numbers = #tpu.dot_dimension_numbers<[2], [1], [1], [2], [0, 0, 0, 1, 1, 2], [0], [0]>} : vector<1x8x4xf32>, vector<1x4x16xf32>, vector<1x8x16xf32> -> vector<1x8x16xf32>
    "tpu.trace_stop"() : () -> ()
    %14 = arith.addf %9, %13 : vector<1x8x16xf32>
    %15 = vector.extract_strided_slice %0 {offsets = [0, 0, 1], sizes = [1, 4, 15], strides = [1, 1, 1]} : vector<1x4x16xf32> to vector<1x4x15xf32>
    %cst_10 = arith.constant 0.000000e+00 : f32
    %16 = vector.broadcast %cst_10 : f32 to vector<1x4x1xf32>
    %17 = tpu.concatenate %15, %16 in 2 : vector<1x4x15xf32>, vector<1x4x1xf32> -> vector<1x4x16xf32>
    %c2 = arith.constant 2 : index
    %c0_11 = arith.constant 0 : index
    %c0_12 = arith.constant 0 : index
    %18 = vector.load %arg2[%c2, %c0_11, %c0_12] : memref<3x8x4xf32, #tpu.memory_space<vmem>>, vector<1x8x4xf32>
    %19 = vector.shape_cast %18 : vector<1x8x4xf32> to vector<8x4xf32>
    %20 = vector.shape_cast %19 : vector<8x4xf32> to vector<1x8x4xf32>
    "tpu.trace_start"() <{level = 10 : i32, message = "boi,bil->bol"}> : () -> ()
    %cst_13 = arith.constant dense<0.000000e+00> : vector<1x8x16xf32>
    %21 = tpu.matmul %20, %17, %cst_13 {dimension_numbers = #tpu.dot_dimension_numbers<[2], [1], [1], [2], [0, 0, 0, 1, 1, 2], [0], [0]>} : vector<1x8x4xf32>, vector<1x4x16xf32>, vector<1x8x16xf32> -> vector<1x8x16xf32>
    "tpu.trace_stop"() : () -> ()
    %22 = arith.addf %14, %21 : vector<1x8x16xf32>
    %c0_14 = arith.constant 0 : index
    %c0_15 = arith.constant 0 : index
    %23 = vector.load %arg3[%c0_14, %c0_15] : memref<8x1xf32, #tpu.memory_space<vmem>>, vector<8x1xf32>
    %24 = vector.shape_cast %23 : vector<8x1xf32> to vector<1x8x1xf32>
    %25 = vector.broadcast %24 : vector<1x8x1xf32> to vector<1x8x16xf32>
    %26 = arith.addf %22, %25 : vector<1x8x16xf32>
    %c0_16 = arith.constant 0 : index
    %c0_17 = arith.constant 0 : index
    %c0_18 = arith.constant 0 : index
    %27 = vector.load %arg4[%c0_16, %c0_17, %c0_18] : memref<1x8x16xf32, #tpu.memory_space<vmem>>, vector<1x8x16xf32>
    tpu.vector_store %arg4[%c0_16, %c0_17, %c0_18], %26 {strides = array<i32>} : memref<1x8x16xf32, #tpu.memory_space<vmem>>, vector<1x8x16xf32>,
    return
  }
  func.func @transform_0(%arg0: i32) -> (i32, i32, i32) {
    %c0_i32 = arith.constant 0 : i32
    %c0_i32_0 = arith.constant 0 : i32
    %c0_i32_1 = arith.constant 0 : i32
    return %arg0, %c0_i32, %c0_i32_0 : i32, i32, i32
  }
  func.func @transform_1(%arg0: i32) -> (i32, i32, i32) {
    %c0_i32 = arith.constant 0 : i32
    %c0_i32_0 = arith.constant 0 : i32
    %c0_i32_1 = arith.constant 0 : i32
    %c0_i32_2 = arith.constant 0 : i32
    return %c0_i32, %c0_i32_0, %c0_i32_1 : i32, i32, i32
  }
  func.func @transform_2(%arg0: i32) -> (i32, i32) {
    %c0_i32 = arith.constant 0 : i32
    %c0_i32_0 = arith.constant 0 : i32
    %c0_i32_1 = arith.constant 0 : i32
    return %c0_i32, %c0_i32_0 : i32, i32
  }
  func.func @transform_3(%arg0: i32) -> (i32, i32, i32) {
    %c0_i32 = arith.constant 0 : i32
    %c0_i32_0 = arith.constant 0 : i32
    %c0_i32_1 = arith.constant 0 : i32
    return %arg0, %c0_i32, %c0_i32_0 : i32, i32, i32
  }
}

</mosaic_0001>

<bundles_post_ra>
// kernel: tpu_custom_call.1
= control target key start
LH: loop header
LB: loop body
LE: loop exit
PB: predicated region body
PF: predicated region fallthrough
CT: control target
= control target key end

     0   :  { %8 = vsyncpa [#allocation3], 0  ;;  %s791_s0 = inlined_call_operand.vmem [shape: f32[2,4,16], index: 0, kind: input, shape index: {}]   ;;  %s792_s1 = inlined_call_operand.vmem [shape: f32[3,8,4], index: 1, kind: input, shape index: {}]   ;;  %s793_s2 = inlined_call_operand.vmem [shape: f32[8,1], index: 2, kind: input, shape index: {}]   ;;  %s794_s3 = inlined_call_operand.hbm [shape: f32[2,8,16], index: 3, kind: output, shape index: {}]  }
   0x1   :  { %10 = vsyncpa [#allocation3 + $0x1], 0  ;;  %s670_s12 = smov 0   ;;  %s672_s13 = smov 0  }
   0x2   :  { %s674_s14 = smov 0   ;;  %s676_s15 = smov 0  }
   0x3 LB: > { %s691_s16 = sadd.s32 4294967295, %s642_s15   ;;  %s495_s17 = sadd.s32 4294967294, %s642_s15   ;;  %s642_s15 = sphi %s676_s15, %s800_s15   ;;  %s638_s14 = sphi %s674_s14, %s799_s14   ;;  %s634_s13 = sphi %s672_s13, %s798_s13   ;;  %s630_s12 = sphi %s670_s12, %s797_s12  }
   0x4   : > { %s695_s18 = sadd.s32 1, %s642_s15   ;;  %s91_s19 = sadd.s32 1, %s638_s14 }
   0x5   : > { %s88_s20 = ssub.s32 %s642_s15, %s695_s18  ;;  %p101_p0 = scmp.ne.s32.totalorder %s638_s14, %s634_s13 }
   0x6   : > { %p89_p1 = scmp.eq.s32.totalorder %s88_s20, 0  ;;  %p102_p2 = scmp.eq.s32.totalorder %s691_s16, 1 }
   0x7   : > { %p107_p3 = scmp.ne.s32.totalorder %s634_s13, %s630_s12  ;;  %p108_p4 = scmp.eq.s32.totalorder %s495_s17, 1 }
   0x8   : > { %s706_s21 = scalar_select %p89_p1, %s638_s14, %s91_s19  }
   0x9   : > { %p708_p5 = por %p102_p2, %p101_p0  ;;  %p712_p6 = por %p108_p4, %p107_p3 }
   0xa   : > { %p498_p7 = scmp.ge.s32.totalorder %s642_s15, 1  ;;  %p139_p8 = scmp.lt.s32.totalorder %s642_s15, 3 }
   0xc   : > { %p140_p9 = pnand %p498_p7, %p139_p8 }
   0xd   : > { %p162_p10 = scmp.lt.s32.totalorder (!%p140_p9), %s691_s16, 1  ;;  %v644_v0 = vmov (!%p140_p9), 0.0   ;;  %vm645_vm0 = vmmov (!%p140_p9), 0   ;;  %v413_v1 = vld [vmem:[%s793_s2] sm:$0xff] (!%p140_p9)  ;;  %v646_v2 = vmov (!%p140_p9), 0   ;;  %vm180_vm1 = vcmask (!%p140_p9), 1043456  }
   0xe   : > { %143 = sbr.rel (%p140_p9) target bundleno = 377 (0x179), region = 32  ;;  %524 = vmatprep.subr.mxu1 (!%p140_p9), %v644_v0  ;;  %519 = vmatprep.subr.mxu0 (!%p140_p9), %v644_v0  ;;  %v501_v3 = vld [vmem:[%s792_s1 + $0x8] sm:$0xff] (!%p140_p9)  ;;  %vm176_vm2 = vcmask (!%p140_p9), 31744   ;;  %s647_s6 = smov (!%p140_p9), 1   ;;  %vm171_vm3 = vcmask (!%p140_p9), 7168   ;;  %v173_v6 = vld [vmem:[%s792_s1] sm:$0xff] (!%p140_p9) }
   0xf   : > { %521 = vmatprep.mubr.msk.f32.mxu0 (!%p140_p9), %vm645_vm0, %v644_v0  ;;  %526 = vmatprep.mubr.msk.f32.mxu1 (!%p140_p9), %vm645_vm0, %v644_v0  ;;  %s648_s7 = smov (!%p140_p9), 127   ;;  %vm332_vm4 = vcmask (!%p140_p9), 121856   ;;  %v506_v9 = vld [vmem:[%s792_s1 + $0x10] sm:$0xff] (!%p140_p9)  ;;  %s159_s17 = sand.u32 (!%p140_p9), 1, %s634_s13   ;;  %vm420_vm5 = vcmask (!%p140_p9), 130048  }
  0x10   : > { %578 = vset.pattern.permute.xlu1 (!%p140_p9), %v646_v2  ;;  %579 = vset.pattern.permute.xlu0 (!%p140_p9), %v646_v2  ;;  %s499_s19 = sshll.u32 (!%p140_p9), %s159_s17, 3  ;;  %s510_s20 = sshll.u32 (!%p140_p9), %s691_s16, 7 }
  0x11   : > { %416 = vperm.xlu1 (!%p140_p9), %578, %v413_v1   ;;  %s749_s28 = scalar_lea.hbm (!%p140_p9), %s794_s3, %s510_s20  ;;  %s423_s29 = scalar_lea.sflag (!%p140_p9), [#allocation3], %s159_s17 }
  0x15   : > { %s163_s24 = scalar_select %p162_p10, %s691_s16, 1 }
  0x16   : > { %s649_s16 = smov [#allocation2]  }
  0x17   : > { %s500_s27 = sshll.u32 %s163_s24, 2  ;;  %s161_s24 = scalar_lea.vmem [#allocation2], %s499_s19 }
  0x18   : > { %s165_s30 = scalar_lea.vmem %s791_s0, %s500_s27  ;;  %s436_s25 = sshll.u32 %s161_s24, 4  ;;  %s751_s25 = int_to_ptr.vmem [resolvable:$true] %s436_s25 }
  0x19   : > { %v166_v4 = vld [vmem:[%s165_s30] sm:$0xf]  ;;  %s580_s30 = scalar_lea.vmem %s751_s25, 128  ;;  %s584_s4 = sshll.u32 %s649_s16, 4  ;;  %s585_s4 = int_to_ptr.vmem [resolvable:$false] %s584_s4 }
  0x1a   : > { %168 = vrot.lane.b32.xlu0 %v166_v4, %s647_s6  ;;  %520 = vmatpush3.msk.msra.mxu0 %vm180_vm1, %v166_v4  ;;  %p581_p11 = scmp.ne.s32.totalorder %s751_s25, %s580_s30  ;;  %s586_s5 = scalar_lea.vmem %s585_s4, 256 }
  0x1b   : > { %522 = vmatmul.mubr.msk.f32.vlgmr.msra.gmra.mrb[0].mxu0 %vm176_vm2, %v501_v3  ;;  %529 = vmatprep.subr.mxu0 %v644_v0  ;;  %p587_p0 = scmp.lt.s32.totalorder %s751_s25, %s585_s4  ;;  %p588_p1 = scmp.lt.s32.totalorder %s586_s5, %s580_s30 }
  0x1c   : > { %531 = vmatprep.mubr.msk.f32.mxu0 %vm645_vm0, %v644_v0  ;;  %p582_p12 = pnand %p581_p11, %p708_p5 }
  0x1d   : > { %p589_p2 = por %p588_p1, %p587_p0 }
  0x1e   : > { %329 = vrot.lane.b32.xlu0 %v166_v4, %s648_s7  ;;  %p583_p13 = pneg %p582_p12 }
  0x20   : > { %p590_p3 = pnand %p589_p2, %p583_p13 }
  0x8c   : > { %v169_v5 = vpop.permute.xlu0 %168 }
  0x8d   : > { %v172_v7 = vsel %vm171_vm3, 0.0, %v169_v5 }
  0x8e   : > { %525 = vmatpush3.msk.msra.mxu1 %vm180_vm1, %v172_v7 }
  0x8f   : > { %527 = vmatmul.mubr.msk.f32.vlgmr.msra.gmra.mrb[0].mxu1 %vm176_vm2, %v173_v6 }
  0x90   : > { %v330_v8 = vpop.permute.xlu0 %329  ;;  %v417_v17 = vpop.permute.xlu1 %416 }
  0x91   : > { %v333_v10 = vsel %vm332_vm4, %v330_v8, 0.0 }
  0x92   : > { %530 = vmatpush3.msk.msra.mxu0 %vm180_vm1, %v333_v10 }
  0x93   : > { %532 = vmatmul.mubr.msk.f32.vlgmr.msra.gmra.mrb[2].mxu0 %vm176_vm2, %v506_v9 }
  0xee   : > { %v249_v11 = vpop.f32.mrb[0].mxu0 }
  0xef   : > { %v523_v12 = vpop.f32.mrb[1].mxu0 }
 0x162   : > { %v325_v13 = vpop.f32.mrb[0].mxu1 }
 0x163   : > { %v326_v14 = vadd.f32 %v325_v13, %v249_v11  ;;  %v528_v15 = vpop.f32.mrb[1].mxu1 }
 0x166   : > { %v408_v16 = vpop.f32.mrb[2].mxu0 }
 0x167   : > { %v412_v18 = vadd.f32 %v408_v16, %v326_v14  ;;  %v533_v19 = vpop.f32.mrb[3].mxu0 }
 0x169   : > { %v419_v20 = vadd.f32 %v417_v17, %v412_v18 }
 0x16b   : > { %421 = vst.msk [vmem:[%s161_s24] sm:$0xff] %vm420_vm5, %v419_v20 }
 0x16c   : > { %593 = shalt.err (!%p590_p3)
}
 0x16d   : > { %s594_s6 = scalar_lea.hbm %s749_s28, 128  ;;  %s598_s9 = scalar_lea.hbm %s794_s3, 256 }
 0x16e   : > { %p595_p4 = scmp.ne.s32.totalorder %s749_s28, %s594_s6  ;;  %p599_p9 = scmp.lt.u32.totalorder %s749_s28, %s794_s3 }
 0x16f   : > { %p600_p10 = scmp.lt.u32.totalorder %s598_s9, %s594_s6  ;;  %p602_p12 = scmp.lt.u32.totalorder %s594_s6, %s749_s28 }
 0x170   : > { %p596_p7 = pnand %p595_p4, %p708_p5 }
 0x171   : > { %p601_p11 = por %p600_p10, %p599_p9 }
 0x172   : > { %p597_p8 = pneg %p596_p7 }
 0x173   : > { %p603_p13 = por %p602_p12, %p601_p11 }
 0x175   : > { %p604_p0 = pnand %p603_p13, %p597_p8 }
 0x177   : > { %607 = shalt.err (!%p604_p0)
}
 0x178   : > { %534 = dma.vmem_to_hbm [thread:$0]  (%p708_p5), %s751_s25, 128, %s749_s28, %s423_s29  }
 0x179 PF: > { %p540_p1 = scmp.ge.s32.totalorder %s642_s15, 2  ;;  %s448_s17 = sand.u32 1, %s630_s12  }
 0x17a   : > { %s449_s19 = scalar_lea.sflag [#allocation3], %s448_s17 }
 0x17b   : > { %p537_p2 = pnand %p540_p1, %p712_p6 }
 0x17d   : > { %625 = dma.done.wait (!%p537_p2), %s449_s19, 128  }
 0x17e   : > { %627 = vsyncadd (!%p537_p2), %s449_s19, 4294967168  ;;  %p13_p3 = scmp.ge.s32.totalorder %s695_s18, 4   ;;  %s797_s12 = smov %s634_s13 }
 0x17f   : > { %s798_s13 = smov %s638_s14  ;;  %s799_s14 = smov %s706_s21 }
 0x180   : > { %s800_s15 = smov %s695_s18  ;;  %15 = sbr.rel (!%p13_p3) target bundleno = 3 (0x3), region = 69 }
 0x187   :  { %454 = vsyncpa [#allocation3], 1 }
 0x188   :  { %456 = vsyncpa [#allocation3 + $0x1], 1 }

</bundles_post_ra>
